<compile_context>
chip_gen: v5e
topology: v5e:2x2
jax: 0.10.0
libtpu: 0.0.40
codegen_flags: <defaults>
</compile_context>

<pallas_src>
import jax
import jax.numpy as jnp
from jax.experimental import pallas as pl
from jax.experimental.pallas import tpu as pltpu

_SMALL_SLAB_BYTES = 1 * 1024 * 1024  # below this a single block is fine


def _round_up(a, b):
    return (a + b - 1) // b * b


def _sublane_pack(dtype):
    # 8 rows for 4-byte dtypes, 16 for 2-byte, 32 for 1-byte (sublane packing).
    return max(8, 32 // jnp.dtype(dtype).itemsize)


def _pick_block_bytes_and_vmem_limit():
    """Per-generation block size: bigger blocks where HBM is faster."""
    block_bytes = 4 * 1024 * 1024   # v5e / v6e sweet spot (~86% roofline)
    vmem_limit = 32 * 1024 * 1024   # 4 x 4 MiB buffers fit easily
    try:
        info = pltpu.get_tpu_info()
        vmem_cap = getattr(info, "vmem_capacity_bytes", None)
        if vmem_cap is not None and vmem_cap <= 80 * 1024 * 1024:
            # v7x-class: 64 MiB/TC VMEM, ~3.2 TB/s HBM -> larger blocks pay off.
            block_bytes = 8 * 1024 * 1024
            vmem_limit = 48 * 1024 * 1024  # 4 x 8 MiB = 32 MiB, leaves headroom
    except Exception:
        pass
    return block_bytes, vmem_limit


def _swish_kernel(x_ref, o_ref):
    x = x_ref[...]
    # Compute in f32 (EUP tanh); bf16-native compute would also be fine on
    # v6e/v7x but f32 is safe on every generation (v5e EUP has no bf16).
    xf = x if x.dtype == jnp.float32 else x.astype(jnp.float32)
    sig = 0.5 * (jnp.tanh(0.5 * xf) + 1.0)  # sigmoid via one EUP tanh
    o_ref[...] = (xf * sig).astype(o_ref.dtype)


def _swish_aligned(x2d):
    """Run the kernel on a (rows, lanes) slab with lanes % 128 == 0."""
    rows, lanes = x2d.shape
    dtype = x2d.dtype
    itemsize = jnp.dtype(dtype).itemsize
    pack = _sublane_pack(dtype)
    block_bytes, vmem_limit = _pick_block_bytes_and_vmem_limit()

    bytes_per_row = lanes * itemsize
    total_bytes = rows * bytes_per_row

    if total_bytes <= _SMALL_SLAB_BYTES:
        # Tiny slab: one block spanning the whole array (block == full dims).
        tile_rows = rows
    else:
        tile_rows = max(pack, (block_bytes // bytes_per_row) // pack * pack)
        # Keep at least 2 grid steps so the parallel grid axis can shard
        # across both v7x TensorCores.
        cap = _round_up(pl.cdiv(rows, 2), pack)
        tile_rows = min(tile_rows, cap)
        # Prefer an even step count for 2-TC balance.
        steps = pl.cdiv(rows, tile_rows)
        if steps > 1 and steps % 2 == 1:
            tile_rows = max(pack, _round_up(pl.cdiv(rows, steps + 1), pack))

    grid = (pl.cdiv(rows, tile_rows),)
    n = rows * lanes
    cost = pl.CostEstimate(
        flops=5 * n,
        transcendentals=n,
        bytes_accessed=2 * n * itemsize,
    )

    return pl.pallas_call(
        _swish_kernel,
        out_shape=jax.ShapeDtypeStruct((rows, lanes), dtype),
        grid=grid,
        in_specs=[pl.BlockSpec((tile_rows, lanes), lambda i: (i, 0))],
        out_specs=pl.BlockSpec((tile_rows, lanes), lambda i: (i, 0)),
        compiler_params=pltpu.CompilerParams(
            dimension_semantics=("parallel",),
            vmem_limit_bytes=vmem_limit,
        ),
        cost_estimate=cost,
    )(x2d)


def swish(x):
    """Elementwise x * sigmoid(x). Accepts any shape; internally flattens."""
    orig_shape = x.shape
    dtype = x.dtype
    n = x.size
    if n == 0:
        return x

    # Widest lane count that divides n exactly -> lane-dense, pad-free slab.
    lanes = 128
    for cand in (1024, 512, 256, 128):
        if n % cand == 0:
            lanes = cand
            break

    x_flat = jnp.reshape(x, (-1,))

    if n % lanes == 0:
        out2d = _swish_aligned(x_flat.reshape(n // lanes, lanes))
        return out2d.reshape(orig_shape)

    # Ragged path: no full-tensor pad + post-slice. Kernel handles the aligned
    # prefix; the (<128-element) tail is negligible and done with plain jnp.
    n_main = (n // lanes) * lanes
    tail = x_flat[n_main:]
    tail_f = tail.astype(jnp.float32)
    tail_out = (tail_f * (0.5 * (jnp.tanh(0.5 * tail_f) + 1.0))).astype(dtype)

    if n_main == 0:
        out_flat = tail_out
    else:
        main_out = _swish_aligned(
            x_flat[:n_main].reshape(n_main // lanes, lanes)
        ).reshape(-1)
        out_flat = jnp.concatenate([main_out, tail_out])
    return out_flat.reshape(orig_shape)


if __name__ == "__main__":
    key = jax.random.PRNGKey(0)

    # NCHW input, as a conv activation in the original model (aligned case).
    x = jax.random.normal(key, (2, 4, 16, 16), dtype=jnp.float32)
    y = jax.block_until_ready(swish(x))
    ref = x * jax.nn.sigmoid(x)
    assert y.shape == x.shape and y.dtype == x.dtype
    assert jnp.allclose(y, ref, atol=1e-5, rtol=1e-5)

    # Tiny ragged case (105 elems < 128): pure jnp-tail path.
    x2 = jax.random.normal(jax.random.PRNGKey(1), (3, 5, 7), dtype=jnp.float32)
    y2 = jax.block_until_ready(swish(x2))
    ref2 = x2 * jax.nn.sigmoid(x2)
    assert y2.shape == x2.shape and y2.dtype == x2.dtype
    assert jnp.allclose(y2, ref2, atol=1e-5, rtol=1e-5)

    # Larger ragged case: kernel on the aligned prefix + jnp tail.
    x3 = jax.random.normal(jax.random.PRNGKey(2), (5, 129), dtype=jnp.float32)
    y3 = jax.block_until_ready(swish(x3))
    ref3 = x3 * jax.nn.sigmoid(x3)
    assert y3.shape == x3.shape and y3.dtype == x3.dtype
    assert jnp.allclose(y3, ref3, atol=1e-5, rtol=1e-5)

    print("KERNEL_OK")
</pallas_src>

<mosaic_0001>
module attributes {stable_mosaic.version = 11 : i64} {
  func.func @_swish_kernel(%arg0: i32, %arg1: memref<2x1024xf32, #tpu.memory_space<vmem>>, %arg2: memref<2x1024xf32, #tpu.memory_space<vmem>>) attributes {dimension_semantics = [#tpu.dimension_semantics<parallel>], iteration_bounds = array<i64: 1>, scalar_prefetch = 0 : i64, scratch_operands = 0 : i64, tpu.core_type = #tpu.core_type<tc>, window_params = [{transform_indices = @transform_0, window_bounds = array<i64: 2, 1024>}, {transform_indices = @transform_1, window_bounds = array<i64: 2, 1024>}]} {
    %c0 = arith.constant 0 : index
    %c0_0 = arith.constant 0 : index
    %0 = vector.load %arg1[%c0, %c0_0] : memref<2x1024xf32, #tpu.memory_space<vmem>>, vector<2x1024xf32>
    %cst = arith.constant 5.000000e-01 : f32
    %1 = vector.broadcast %cst : f32 to vector<2x1024xf32>
    %2 = arith.mulf %1, %0 : vector<2x1024xf32>
    %3 = math.tanh %2 : vector<2x1024xf32>
    %cst_1 = arith.constant 1.000000e+00 : f32
    %4 = vector.broadcast %cst_1 : f32 to vector<2x1024xf32>
    %5 = arith.addf %3, %4 : vector<2x1024xf32>
    %cst_2 = arith.constant 5.000000e-01 : f32
    %6 = vector.broadcast %cst_2 : f32 to vector<2x1024xf32>
    %7 = arith.mulf %6, %5 : vector<2x1024xf32>
    %8 = arith.mulf %0, %7 : vector<2x1024xf32>
    %c0_3 = arith.constant 0 : index
    %c0_4 = arith.constant 0 : index
    %9 = vector.load %arg2[%c0_3, %c0_4] : memref<2x1024xf32, #tpu.memory_space<vmem>>, vector<2x1024xf32>
    tpu.vector_store %arg2[%c0_3, %c0_4], %8 {strides = array<i32>} : memref<2x1024xf32, #tpu.memory_space<vmem>>, vector<2x1024xf32>,
    return
  }
  func.func @transform_0(%arg0: i32) -> (i32, i32) {
    %c0_i32 = arith.constant 0 : i32
    %c0_i32_0 = arith.constant 0 : i32
    return %arg0, %c0_i32 : i32, i32
  }
  func.func @transform_1(%arg0: i32) -> (i32, i32) {
    %c0_i32 = arith.constant 0 : i32
    %c0_i32_0 = arith.constant 0 : i32
    return %arg0, %c0_i32 : i32, i32
  }
}

</mosaic_0001>

<bundles_post_ra>
// kernel: tpu_custom_call.1
= control target key start
LH: loop header
LB: loop body
LE: loop exit
PB: predicated region body
PF: predicated region fallthrough
CT: control target
= control target key end

     0   :  { %6 = vsyncpa [#allocation3], 0  ;;  %s130_s0 = inlined_call_operand.hbm [shape: f32[2,1024], index: 0, kind: input, shape index: {}]   ;;  %s131_s1 = inlined_call_operand.hbm [shape: f32[2,1024], index: 1, kind: output, shape index: {}]  }
   0x1   :  { %7 = vsyncpa [#allocation4], 0  ;;  %s13_s8 = sshll.u32 %s130_s0, 4  ;;  %s112_s9 = smov [#allocation2]   ;;  %s14_s8 = int_to_ptr.hbm [resolvable:$true] %s13_s8 }
   0x2   :  { %s15_s10 = sshll.u32 %s112_s9, 4  ;;  %s16_s10 = int_to_ptr.vmem [resolvable:$true] %s15_s10 }
   0x3   :  { %18 = dma.hbm_to_vmem [thread:$0]  %s14_s8, 256, %s16_s10, [#allocation3]  }
   0x4   :  { %108 = dma.done.wait [#allocation3], 256  }
   0x5   :  { %109 = vsyncadd [#allocation3], 4294967040  ;;  %v23_v0 = vld [vmem:[#allocation2] sm:$0xff]  ;;  %v24_v1 = vld [vmem:[#allocation2 + $0x8] sm:$0xff]  ;;  %s113_s11 = smov [#allocation5]   ;;  %s44_s14 = sshll.u32 %s131_s1, 4  ;;  %s45_s14 = int_to_ptr.hbm [resolvable:$true] %s44_s14 }
   0x6   :  { %v25_v2 = vmul.f32 0.5, %v23_v0  ;;  %v26_v3 = vmul.f32 0.5, %v24_v1  ;;  %s42_s0 = sshll.u32 %s113_s11, 4  ;;  %s43_s0 = int_to_ptr.vmem [resolvable:$true] %s42_s0 }
   0x8   :  { %56 = vtanh.f32 %v25_v2 }
   0x9   :  { %58 = vtanh.f32 %v26_v3 }
   0xe   :  { %v57_v4 = vpop.eup %56 }
   0xf   :  { %v59_v5 = vpop.eup %58  ;;  %v29_v6 = vadd.f32 1.0, %v57_v4 }
  0x10   :  { %v30_v7 = vadd.f32 1.0, %v59_v5 }
  0x11   :  { %v31_v8 = vmul.f32 0.5, %v29_v6 }
  0x12   :  { %v32_v9 = vmul.f32 0.5, %v30_v7 }
  0x13   :  { %v33_v10 = vmul.f32 %v31_v8, %v23_v0 }
  0x14   :  { %v34_v11 = vmul.f32 %v32_v9, %v24_v1 }
  0x15   :  { %35 = vst [vmem:[#allocation5] sm:$0xff] %v33_v10 }
  0x16   :  { %36 = vst [vmem:[#allocation5 + $0x8] sm:$0xff] %v34_v11 }
  0x17   :  { %47 = dma.vmem_to_hbm [thread:$0]  %s43_s0, 256, %s45_s14, [#allocation4]  }
  0x18   :  { %110 = dma.done.wait [#allocation4], 256  }
  0x19   :  { %111 = vsyncadd [#allocation4], 4294967040 }
  0x1a   :  { %52 = vsyncpa [#allocation3], 1 }
  0x1b   :  { %53 = vsyncpa [#allocation4], 1 }

</bundles_post_ra>
